<compile_context>
chip_gen: v7x
topology: tpu7x:2x2x1
jax: 0.10.0
libtpu: 0.0.40
codegen_flags: <defaults>
</compile_context>

<pallas_src>
import functools

import jax
import jax.numpy as jnp
from jax.experimental import pallas as pl
from jax.experimental.pallas import tpu as pltpu


def _value_net_kernel(x_ref,
                      w1_ref, b1_ref,
                      w2_ref, b2_ref,
                      w3_ref, b3_ref,
                      w4_ref, b4_ref,
                      out_ref):
    """Fused forward for one batch tile: out(1,TB) = MLP(x(TB,S))."""
    wdt = w1_ref.dtype                      # weight compute dtype (f32 or bf16)
    x = x_ref[...].astype(wdt)

    # Layers 1-3: MXU matmuls with f32 accumulation, f32 bias-add + ReLU.
    h = jnp.dot(x, w1_ref[...], preferred_element_type=jnp.float32) + b1_ref[...]
    h = jnp.maximum(h, 0.0)

    h = jnp.dot(h.astype(wdt), w2_ref[...],
                preferred_element_type=jnp.float32) + b2_ref[...]
    h = jnp.maximum(h, 0.0)

    h = jnp.dot(h.astype(wdt), w3_ref[...],
                preferred_element_type=jnp.float32) + b3_ref[...]
    h = jnp.maximum(h, 0.0)

    # Layer 4 (H -> 1): VPU multiply + lane reduction (skips an N=1 MXU
    # matmul) producing a lane-dense (1, TB) output row.
    w4_row = w4_ref[...].astype(jnp.float32)            # (1, H)
    row = jnp.sum(h * w4_row, axis=-1)                  # (TB,)
    row = row[None, :] + b4_ref[...]                    # (1, TB), bias bcast
    out_ref[...] = row.astype(out_ref.dtype)


def init_value_network_params(key, state_dim, hidden_dim, init_w=0.003,
                              param_dtype=jnp.float32):
    """Mirrors nn.Linear default init + uniform(-init_w, init_w) on layer 4.

    Weights are (in, out) (transpose of PyTorch); w4 is stored as a (1, H)
    row; biases are always f32.
    """
    keys = jax.random.split(key, 8)

    def linear_init(kw, kb, fan_in, fan_out):
        bound = 1.0 / (float(fan_in) ** 0.5)
        w = jax.random.uniform(kw, (fan_in, fan_out), jnp.float32, -bound, bound)
        b = jax.random.uniform(kb, (1, fan_out), jnp.float32, -bound, bound)
        return w.astype(param_dtype), b

    w1, b1 = linear_init(keys[0], keys[1], state_dim, hidden_dim)
    w2, b2 = linear_init(keys[2], keys[3], hidden_dim, hidden_dim)
    w3, b3 = linear_init(keys[4], keys[5], hidden_dim, hidden_dim)
    # linear4: uniform_(-init_w, init_w) for both weight and bias.
    w4 = jax.random.uniform(keys[6], (1, hidden_dim), jnp.float32,
                            -init_w, init_w).astype(param_dtype)
    b4 = jax.random.uniform(keys[7], (1, 1), jnp.float32, -init_w, init_w)

    return dict(w1=w1, b1=b1, w2=w2, b2=b2, w3=w3, b3=b3, w4=w4, b4=b4)


def _round_up(x, m):
    return ((x + m - 1) // m) * m


@functools.partial(jax.jit, static_argnames=("batch_tile",))
def value_network_forward(state, params, *, batch_tile=None):
    """state: (B, state_dim) -> (B, 1) float32."""
    B, S = state.shape
    H = params["w1"].shape[1]

    # Batch tile: 128 rows (fills MXU/vreg sublanes) once the batch is big
    # enough; otherwise a single sublane-aligned tile.
    if batch_tile is None:
        TB = 128 if B >= 128 else _round_up(B, 8)
    else:
        TB = batch_tile
    B_pad = _round_up(B, TB)
    num_tiles = B_pad // TB

    x = state.astype(jnp.float32)
    if B_pad != B:
        x = jnp.pad(x, ((0, B_pad - B), (0, 0)))   # tail tile padded with zeros

    weights = (params["w1"], params["b1"], params["w2"], params["b2"],
               params["w3"], params["b3"], params["w4"], params["b4"])

    # --- VMEM / cost bookkeeping (generation-aware sizing) ------------------
    weight_bytes = sum(int(w.size) * w.dtype.itemsize for w in weights)
    act_bytes = TB * max(S, H) * 4
    # resident weights (x2: conservative vs pipeline double-buffering) +
    # double-buffered activation & output tiles + a few f32 temporaries.
    vmem_need = 2 * weight_bytes + 2 * (TB * S * 4 + TB * 4) + 4 * act_bytes
    vmem_limit = max(32 * 1024 * 1024, int(1.25 * vmem_need))

    flops = 2 * B_pad * (S * H + H * H + H * H + H)
    bytes_accessed = int(x.size) * 4 + weight_bytes + B_pad * 4
    cost = pl.CostEstimate(flops=flops, transcendentals=0,
                           bytes_accessed=bytes_accessed)

    # Grid-invariant blocks: full-extent with a constant index_map, so the
    # weight DMA happens once and the block stays VMEM-resident.
    def resident(arr):
        return pl.BlockSpec(arr.shape, lambda i: (0, 0))

    out_row = pl.pallas_call(
        _value_net_kernel,
        out_shape=jax.ShapeDtypeStruct((1, B_pad), jnp.float32),
        grid=(num_tiles,),
        in_specs=[
            pl.BlockSpec((TB, S), lambda i: (i, 0)),        # x: tiled on batch
            resident(params["w1"]), resident(params["b1"]),
            resident(params["w2"]), resident(params["b2"]),
            resident(params["w3"]), resident(params["b3"]),
            resident(params["w4"]), resident(params["b4"]),
        ],
        # Lane-dense output: each grid step writes a (1, TB) lane block.
        out_specs=pl.BlockSpec((1, TB), lambda i: (0, i)),
        compiler_params=pltpu.CompilerParams(
            dimension_semantics=("parallel",),   # megacore sharding on v7x
            vmem_limit_bytes=vmem_limit,
        ),
        cost_estimate=cost,
    )(x, *weights)

    # Layout plumbing only: (1, B_pad) row -> (B, 1) column.
    return out_row.reshape(B_pad, 1)[:B]


def value_network_reference(state, params):
    """Pure-JAX f32 reference for correctness checking."""
    f32 = lambda a: a.astype(jnp.float32)
    h = jnp.maximum(state @ f32(params["w1"]) + params["b1"], 0.0)
    h = jnp.maximum(h @ f32(params["w2"]) + params["b2"], 0.0)
    h = jnp.maximum(h @ f32(params["w3"]) + params["b3"], 0.0)
    return h @ f32(params["w4"]).T + params["b4"]


if __name__ == "__main__":
    batch, state_dim, hidden_dim = 256, 16, 32   # 2 batch tiles of 128

    root = jax.random.PRNGKey(0)
    k_params, k_state = jax.random.split(root)

    state = jax.random.normal(k_state, (batch, state_dim), jnp.float32)

    # f32 weights: tight check against the pure-JAX reference.
    params_f32 = init_value_network_params(k_params, state_dim, hidden_dim,
                                           init_w=0.003,
                                           param_dtype=jnp.float32)
    out = value_network_forward(state, params_f32)
    jax.block_until_ready(out)
    ref = value_network_reference(state, params_f32)
    assert out.shape == (batch, 1), out.shape
    assert jnp.allclose(out, ref, atol=1e-5, rtol=1e-5), "f32 mismatch vs reference"

    # bf16 weights (halved weight traffic): looser tolerance vs f32 reference.
    params_bf16 = init_value_network_params(k_params, state_dim, hidden_dim,
                                            init_w=0.003,
                                            param_dtype=jnp.bfloat16)
    out_bf16 = value_network_forward(state, params_bf16)
    jax.block_until_ready(out_bf16)
    assert jnp.allclose(out_bf16, value_network_reference(state, params_bf16),
                        atol=2e-2, rtol=2e-2), "bf16 mismatch vs reference"

    # Ragged batch: exercises the tail-tile padding path.
    out_tail = value_network_forward(state[:100], params_f32)
    jax.block_until_ready(out_tail)
    assert out_tail.shape == (100, 1), out_tail.shape
    assert jnp.allclose(out_tail, ref[:100], atol=1e-5, rtol=1e-5), "tail mismatch"

    print("KERNEL_OK")
</pallas_src>

<mosaic_0001>
module attributes {stable_mosaic.version = 11 : i64} {
  func.func @_value_net_kernel(%arg0: i32, %arg1: memref<128x16xf32, #tpu.memory_space<vmem>>, %arg2: memref<16x32xf32, #tpu.memory_space<vmem>>, %arg3: memref<1x32xf32, #tpu.memory_space<vmem>>, %arg4: memref<32x32xf32, #tpu.memory_space<vmem>>, %arg5: memref<1x32xf32, #tpu.memory_space<vmem>>, %arg6: memref<32x32xf32, #tpu.memory_space<vmem>>, %arg7: memref<1x32xf32, #tpu.memory_space<vmem>>, %arg8: memref<1x32xf32, #tpu.memory_space<vmem>>, %arg9: memref<1x1xf32, #tpu.memory_space<vmem>>, %arg10: memref<1x128xf32, #tpu.memory_space<vmem>>) attributes {dimension_semantics = [#tpu.dimension_semantics<parallel>], iteration_bounds = array<i64: 2>, scalar_prefetch = 0 : i64, scratch_operands = 0 : i64, tpu.core_type = #tpu.core_type<tc>, window_params = [{transform_indices = @transform_0, window_bounds = array<i64: 128, 16>}, {pipeline_mode = #tpu.pipeline_mode<synchronous>, transform_indices = @transform_1, window_bounds = array<i64: 16, 32>}, {pipeline_mode = #tpu.pipeline_mode<synchronous>, transform_indices = @transform_2, window_bounds = array<i64: 1, 32>}, {pipeline_mode = #tpu.pipeline_mode<synchronous>, transform_indices = @transform_3, window_bounds = array<i64: 32, 32>}, {pipeline_mode = #tpu.pipeline_mode<synchronous>, transform_indices = @transform_4, window_bounds = array<i64: 1, 32>}, {pipeline_mode = #tpu.pipeline_mode<synchronous>, transform_indices = @transform_5, window_bounds = array<i64: 32, 32>}, {pipeline_mode = #tpu.pipeline_mode<synchronous>, transform_indices = @transform_6, window_bounds = array<i64: 1, 32>}, {pipeline_mode = #tpu.pipeline_mode<synchronous>, transform_indices = @transform_7, window_bounds = array<i64: 1, 32>}, {pipeline_mode = #tpu.pipeline_mode<synchronous>, transform_indices = @transform_8, window_bounds = array<i64: 1, 1>}, {transform_indices = @transform_9, window_bounds = array<i64: 1, 128>}]} {
    %c0 = arith.constant 0 : index
    %c0_0 = arith.constant 0 : index
    %0 = vector.load %arg1[%c0, %c0_0] : memref<128x16xf32, #tpu.memory_space<vmem>>, vector<128x16xf32>
    %c0_1 = arith.constant 0 : index
    %c0_2 = arith.constant 0 : index
    %1 = vector.load %arg2[%c0_1, %c0_2] : memref<16x32xf32, #tpu.memory_space<vmem>>, vector<16x32xf32>
    %cst = arith.constant dense<0.000000e+00> : vector<128x32xf32>
    %2 = tpu.matmul %0, %1, %cst {dimension_numbers = #tpu.dot_dimension_numbers<[1], [0], [0], [1], [0, 0, 1, 1], [], []>} : vector<128x16xf32>, vector<16x32xf32>, vector<128x32xf32> -> vector<128x32xf32>
    %c0_3 = arith.constant 0 : index
    %c0_4 = arith.constant 0 : index
    %3 = vector.load %arg3[%c0_3, %c0_4] : memref<1x32xf32, #tpu.memory_space<vmem>>, vector<1x32xf32>
    %4 = vector.broadcast %3 : vector<1x32xf32> to vector<128x32xf32>
    %5 = arith.addf %2, %4 : vector<128x32xf32>
    %cst_5 = arith.constant 0.000000e+00 : f32
    %6 = vector.broadcast %cst_5 : f32 to vector<128x32xf32>
    %7 = arith.maximumf %5, %6 : vector<128x32xf32>
    %c0_6 = arith.constant 0 : index
    %c0_7 = arith.constant 0 : index
    %8 = vector.load %arg4[%c0_6, %c0_7] : memref<32x32xf32, #tpu.memory_space<vmem>>, vector<32x32xf32>
    %cst_8 = arith.constant dense<0.000000e+00> : vector<128x32xf32>
    %9 = tpu.matmul %7, %8, %cst_8 {dimension_numbers = #tpu.dot_dimension_numbers<[1], [0], [0], [1], [0, 0, 1, 1], [], []>} : vector<128x32xf32>, vector<32x32xf32>, vector<128x32xf32> -> vector<128x32xf32>
    %c0_9 = arith.constant 0 : index
    %c0_10 = arith.constant 0 : index
    %10 = vector.load %arg5[%c0_9, %c0_10] : memref<1x32xf32, #tpu.memory_space<vmem>>, vector<1x32xf32>
    %11 = vector.broadcast %10 : vector<1x32xf32> to vector<128x32xf32>
    %12 = arith.addf %9, %11 : vector<128x32xf32>
    %cst_11 = arith.constant 0.000000e+00 : f32
    %13 = vector.broadcast %cst_11 : f32 to vector<128x32xf32>
    %14 = arith.maximumf %12, %13 : vector<128x32xf32>
    %c0_12 = arith.constant 0 : index
    %c0_13 = arith.constant 0 : index
    %15 = vector.load %arg6[%c0_12, %c0_13] : memref<32x32xf32, #tpu.memory_space<vmem>>, vector<32x32xf32>
    %cst_14 = arith.constant dense<0.000000e+00> : vector<128x32xf32>
    %16 = tpu.matmul %14, %15, %cst_14 {dimension_numbers = #tpu.dot_dimension_numbers<[1], [0], [0], [1], [0, 0, 1, 1], [], []>} : vector<128x32xf32>, vector<32x32xf32>, vector<128x32xf32> -> vector<128x32xf32>
    %c0_15 = arith.constant 0 : index
    %c0_16 = arith.constant 0 : index
    %17 = vector.load %arg7[%c0_15, %c0_16] : memref<1x32xf32, #tpu.memory_space<vmem>>, vector<1x32xf32>
    %18 = vector.broadcast %17 : vector<1x32xf32> to vector<128x32xf32>
    %19 = arith.addf %16, %18 : vector<128x32xf32>
    %cst_17 = arith.constant 0.000000e+00 : f32
    %20 = vector.broadcast %cst_17 : f32 to vector<128x32xf32>
    %21 = arith.maximumf %19, %20 : vector<128x32xf32>
    %c0_18 = arith.constant 0 : index
    %c0_19 = arith.constant 0 : index
    %22 = vector.load %arg8[%c0_18, %c0_19] : memref<1x32xf32, #tpu.memory_space<vmem>>, vector<1x32xf32>
    %23 = vector.broadcast %22 : vector<1x32xf32> to vector<128x32xf32>
    %24 = arith.mulf %21, %23 : vector<128x32xf32>
    %cst_20 = arith.constant dense<0.000000e+00> : vector<128xf32>
    %25 = vector.multi_reduction <add>, %24, %cst_20 [1] : vector<128x32xf32> to vector<128xf32>
    %26 = vector.shape_cast %25 : vector<128xf32> to vector<1x128xf32>
    %c0_21 = arith.constant 0 : index
    %c0_22 = arith.constant 0 : index
    %27 = vector.load %arg9[%c0_21, %c0_22] : memref<1x1xf32, #tpu.memory_space<vmem>>, vector<1x1xf32>
    %28 = vector.broadcast %27 : vector<1x1xf32> to vector<1x128xf32>
    %29 = arith.addf %26, %28 : vector<1x128xf32>
    %c0_23 = arith.constant 0 : index
    %c0_24 = arith.constant 0 : index
    %30 = vector.load %arg10[%c0_23, %c0_24] : memref<1x128xf32, #tpu.memory_space<vmem>>, vector<1x128xf32>
    tpu.vector_store %arg10[%c0_23, %c0_24], %29 {strides = array<i32>} : memref<1x128xf32, #tpu.memory_space<vmem>>, vector<1x128xf32>,
    return
  }
  func.func @transform_0(%arg0: i32) -> (i32, i32) {
    %c0_i32 = arith.constant 0 : i32
    %c0_i32_0 = arith.constant 0 : i32
    return %arg0, %c0_i32 : i32, i32
  }
  func.func @transform_1(%arg0: i32) -> (i32, i32) {
    %c0_i32 = arith.constant 0 : i32
    %c0_i32_0 = arith.constant 0 : i32
    %c0_i32_1 = arith.constant 0 : i32
    return %c0_i32, %c0_i32_0 : i32, i32
  }
  func.func @transform_2(%arg0: i32) -> (i32, i32) {
    %c0_i32 = arith.constant 0 : i32
    %c0_i32_0 = arith.constant 0 : i32
    %c0_i32_1 = arith.constant 0 : i32
    return %c0_i32, %c0_i32_0 : i32, i32
  }
  func.func @transform_3(%arg0: i32) -> (i32, i32) {
    %c0_i32 = arith.constant 0 : i32
    %c0_i32_0 = arith.constant 0 : i32
    %c0_i32_1 = arith.constant 0 : i32
    return %c0_i32, %c0_i32_0 : i32, i32
  }
  func.func @transform_4(%arg0: i32) -> (i32, i32) {
    %c0_i32 = arith.constant 0 : i32
    %c0_i32_0 = arith.constant 0 : i32
    %c0_i32_1 = arith.constant 0 : i32
    return %c0_i32, %c0_i32_0 : i32, i32
  }
  func.func @transform_5(%arg0: i32) -> (i32, i32) {
    %c0_i32 = arith.constant 0 : i32
    %c0_i32_0 = arith.constant 0 : i32
    %c0_i32_1 = arith.constant 0 : i32
    return %c0_i32, %c0_i32_0 : i32, i32
  }
  func.func @transform_6(%arg0: i32) -> (i32, i32) {
    %c0_i32 = arith.constant 0 : i32
    %c0_i32_0 = arith.constant 0 : i32
    %c0_i32_1 = arith.constant 0 : i32
    return %c0_i32, %c0_i32_0 : i32, i32
  }
  func.func @transform_7(%arg0: i32) -> (i32, i32) {
    %c0_i32 = arith.constant 0 : i32
    %c0_i32_0 = arith.constant 0 : i32
    %c0_i32_1 = arith.constant 0 : i32
    return %c0_i32, %c0_i32_0 : i32, i32
  }
  func.func @transform_8(%arg0: i32) -> (i32, i32) {
    %c0_i32 = arith.constant 0 : i32
    %c0_i32_0 = arith.constant 0 : i32
    %c0_i32_1 = arith.constant 0 : i32
    return %c0_i32, %c0_i32_0 : i32, i32
  }
  func.func @transform_9(%arg0: i32) -> (i32, i32) {
    %c0_i32 = arith.constant 0 : i32
    %c0_i32_0 = arith.constant 0 : i32
    return %c0_i32, %arg0 : i32, i32
  }
}

</mosaic_0001>

<bundles_post_ra>
// kernel: value_network_forward.1
= control target key start
LH: loop header
LB: loop body
LE: loop exit
PB: predicated region body
PF: predicated region fallthrough
CT: control target
= control target key end

     0   :  { %s2018_s0 = inlined_call_operand.vmem [shape: f32[256,16], index: 0, kind: input, shape index: {}]   ;;  %s2019_s1 = inlined_call_operand.vmem [shape: f32[16,32], index: 1, kind: input, shape index: {}]   ;;  %s2020_s2 = inlined_call_operand.vmem [shape: f32[1,32], index: 2, kind: input, shape index: {}]   ;;  %s2021_s3 = inlined_call_operand.vmem [shape: f32[32,32], index: 3, kind: input, shape index: {}]   ;;  %s2022_s4 = inlined_call_operand.vmem [shape: f32[1,32], index: 4, kind: input, shape index: {}]   ;;  %s2023_s5 = inlined_call_operand.vmem [shape: f32[32,32], index: 5, kind: input, shape index: {}]   ;;  %s2024_s6 = inlined_call_operand.vmem [shape: f32[1,32], index: 6, kind: input, shape index: {}]   ;;  %s2025_s7 = inlined_call_operand.vmem [shape: f32[1,32], index: 7, kind: input, shape index: {}]   ;;  %s2026_s8 = inlined_call_operand.<no memory space> [shape: f32[1,1], index: 8, kind: input, shape index: {}]   ;;  %s2027_s9 = inlined_call_operand.hbm [shape: f32[1,256], index: 9, kind: output, shape index: {}]  }
   0x1   :  { %v14_v0 = vstv %s2026_s8 }
   0x2   :  { %15 = vst [vmem:[#allocation2] sm:$0x1] %v14_v0 }
   0x3   :  { %16 = vsyncpa [#allocation4], 0 }
   0x4   :  { %18 = vsyncpa [#allocation4 + $0x1], 0  ;;  %s1698_s11 = smov 0   ;;  %s1700_s12 = smov 0  }
   0x5   :  { %s1702_s13 = smov 0   ;;  %s1704_s14 = smov 0  }
   0x6 LB: > { %s1303_s8 = sadd.s32 4294967295, %s1641_s14   ;;  %s1304_s15 = sadd.s32 4294967294, %s1641_s14   ;;  %s1641_s14 = sphi %s1704_s14, %s2033_s14   ;;  %s1637_s13 = sphi %s1702_s13, %s2032_s13   ;;  %s1633_s12 = sphi %s1700_s12, %s2031_s12   ;;  %s1629_s11 = sphi %s1698_s11, %s2030_s11  }
   0x7   : > { %s1721_s16 = sadd.s32 1, %s1641_s14   ;;  %s225_s17 = sadd.s32 1, %s1637_s13 }
   0x8   : > { %s222_s18 = ssub.s32 %s1641_s14, %s1721_s16  ;;  %p235_p0 = scmp.ne.s32.totalorder %s1637_s13, %s1633_s12 }
   0x9   : > { %p223_p1 = scmp.eq.s32.totalorder %s222_s18, 0  ;;  %p236_p2 = scmp.eq.s32.totalorder %s1303_s8, 1 }
   0xa   : > { %p241_p3 = scmp.ne.s32.totalorder %s1633_s12, %s1629_s11  ;;  %p242_p4 = scmp.eq.s32.totalorder %s1304_s15, 1 }
   0xb   : > { %s1731_s19 = scalar_select %p223_p1, %s1637_s13, %s225_s17  }
   0xc   : > { %p1733_p5 = por %p236_p2, %p235_p0  ;;  %p1737_p6 = por %p242_p4, %p241_p3 }
   0xd   : > { %p1307_p7 = scmp.ge.s32.totalorder %s1641_s14, 1  ;;  %p293_p8 = scmp.lt.s32.totalorder %s1641_s14, 3 }
   0xf   : > { %p294_p9 = pnand %p1307_p7, %p293_p8 }
  0x10   : > { %v350_v1 = vld [vmem:[%s2019_s1] sm:$0xff] (!%p294_p9)  ;;  %v351_v2 = vld [vmem:[%s2019_s1 + $0x8] sm:$0xff] (!%p294_p9)  ;;  %s1749_s26 = sshll.u32 (!%p294_p9), %s1303_s8, 4  ;;  %vm359_vm0 = vcmask (!%p294_p9), 130048   ;;  %v571_v7 = vld [vmem:[%s2021_s3 + $0x10] sm:$0xff] (!%p294_p9)  ;;  %vm580_vm1 = vcmask (!%p294_p9), 261120  }
  0x11   : > { %297 = sbr.rel (%p294_p9) target bundleno = 915 (0x393), region = 56  ;;  %v569_v3 = vld [vmem:[%s2021_s3] sm:$0xff] (!%p294_p9)  ;;  %v1515_v4 = vpack.c.bf16 (!%p294_p9), %v351_v2, %v350_v1  ;;  %p329_p10 = scmp.lt.s32.totalorder (!%p294_p9), %s1749_s26, 31  ;;  %v570_v5 = vld [vmem:[%s2021_s3 + $0x8] sm:$0xff] (!%p294_p9)  ;;  %v572_v8 = vld [vmem:[%s2021_s3 + $0x18] sm:$0xff] (!%p294_p9)  ;;  %vm1134_vm2 = vcmask (!%p294_p9), 130112  }
  0x12   : > { %v1519_v6 = vpack.c.bf16 (!%p294_p9), %v570_v5, %v569_v3  ;;  %v1523_v13 = vpack.c.bf16 (!%p294_p9), %v572_v8, %v571_v7  ;;  %v790_v26 = vld [vmem:[%s2023_s5] sm:$0xff] (!%p294_p9)  ;;  %v791_v27 = vld [vmem:[%s2023_s5 + $0x8] sm:$0xff] (!%p294_p9)  ;;  %v792_v28 = vld [vmem:[%s2023_s5 + $0x10] sm:$0xff] (!%p294_p9)  ;;  %vm1141_vm3 = vcmask (!%p294_p9), 195712   ;;  %vm1148_vm4 = vcmask (!%p294_p9), 261312   ;;  %s326_s30 = sand.u32 (!%p294_p9), 1, %s1633_s12  }
  0x13   : > { %1516 = vmatprep.subr.bf16.mxu0 (!%p294_p9), %v1515_v4  ;;  %1535 = vmatprep.subr.bf16.mxu1 (!%p294_p9), %v1515_v4  ;;  %v1527_v29 = vpack.c.bf16 (!%p294_p9), %v791_v27, %v790_v26  ;;  %v793_v30 = vld [vmem:[%s2023_s5 + $0x18] sm:$0xff] (!%p294_p9)  ;;  %v1310_v32 = vld [vmem:[%s2020_s2] ss:$0 sm:$0xff] (!%p294_p9)  ;;  %vm1155_vm5 = vcmask (!%p294_p9), 326912   ;;  %vm1162_vm6 = vcmask (!%p294_p9), 392512   ;;  %vm1169_vm7 = vcmask (!%p294_p9), 458112  }
  0x14   : > { %1518 = vmatpush3.bf16.msra.mxu0 (!%p294_p9), %v1515_v4  ;;  %1536 = vmatpush3.bf16.msra.mxu1 (!%p294_p9), %v1515_v4  ;;  %v1531_v31 = vpack.c.bf16 (!%p294_p9), %v793_v30, %v792_v28  ;;  %vm1176_vm8 = vcmask (!%p294_p9), 523712   ;;  %vm1183_vm9 = vcmask (!%p294_p9), 589312   ;;  %vm1190_vm10 = vcmask (!%p294_p9), 654912   ;;  %s1237_s22 = scalar_lea.sflag (!%p294_p9), [#allocation4], %s326_s30  ;;  %s1644_s24 = smov (!%p294_p9), [#allocation3]  }
  0x15   : > { %1520 = vmatprep.subr.bf16.mxu1 (!%p294_p9), %v1519_v6  ;;  %1528 = vmatprep.subr.bf16.mxu0 (!%p294_p9), %v1527_v29  ;;  %vm1197_vm11 = vcmask (!%p294_p9), 720512   ;;  %vm1204_vm12 = vcmask (!%p294_p9), 786112   ;;  %vm1211_vm13 = vcmask (!%p294_p9), 851712   ;;  %vm1218_vm14 = vcmask (!%p294_p9), 917312   ;;  %s1583_s25 = sshll.u32 (!%p294_p9), %s1644_s24, 4  ;;  %s1584_s25 = int_to_ptr.vmem [resolvable:$false] %s1583_s25 }
  0x16   : > { %vm1225_vm15 = vcmask (!%p294_p9), 982912   ;;  %s1585_s27 = scalar_lea.vmem (!%p294_p9), %s1584_s25, 32 }
  0x18   : > { %s330_s10 = scalar_select %p329_p10, %s1749_s26, 31 }
  0x1a   : > { %s1309_s8 = sshll.u32 %s330_s10, 3  ;;  %s327_s10 = scalar_lea.vmem [#allocation3], %s326_s30 }
  0x1b   : > { %s1762_s18 = scalar_lea.vmem %s2018_s0, %s1309_s8  ;;  %s1249_s8 = sshll.u32 %s327_s10, 4  ;;  %s1976_s8 = int_to_ptr.vmem [resolvable:$true] %s1249_s8 }
  0x1c   : > { %v334_v9 = vld [vmem:[%s1762_s18] sm:$0xff]  ;;  %v335_v10 = vld [vmem:[%s1762_s18 + $0x8] sm:$0xff]  ;;  %v336_v11 = vld [vmem:[%s1762_s18 + $0x10] sm:$0xff]  ;;  %s1579_s23 = scalar_lea.vmem %s1976_s8, 16  ;;  %p1586_p0 = scmp.lt.s32.totalorder %s1976_s8, %s1584_s25 }
  0x1d   : > { %1427 = vmatprep.mubr.msk.f32.mxu0 %vm359_vm0, %v334_v9  ;;  %v342_v12 = vld [vmem:[%s1762_s18 + $0x40] sm:$0xff]  ;;  %v337_v14 = vld [vmem:[%s1762_s18 + $0x18] sm:$0xff]  ;;  %v343_v15 = vld [vmem:[%s1762_s18 + $0x48] sm:$0xff]  ;;  %p1580_p11 = scmp.ne.s32.totalorder %s1976_s8, %s1579_s23  ;;  %p1587_p1 = scmp.lt.s32.totalorder %s1585_s27, %s1579_s23 }
  0x1e   : > { %1428 = vmatmul.mubr.msk.f32.vlgmr.msra.gmra.mrb[0].mxu0 %vm359_vm0, %v335_v10  ;;  %1439 = vmatprep.mubr.msk.f32.mxu1 %vm359_vm0, %v342_v12  ;;  %v344_v16 = vld [vmem:[%s1762_s18 + $0x50] sm:$0xff]  ;;  %v338_v17 = vld [vmem:[%s1762_s18 + $0x20] sm:$0xff]  ;;  %v345_v18 = vld [vmem:[%s1762_s18 + $0x58] sm:$0xff] }
  0x1f   : > { %1430 = vmatprep.mubr.msk.f32.mxu0 %vm359_vm0, %v336_v11  ;;  %1440 = vmatmul.mubr.msk.f32.vlgmr.msra.gmra.mrb[0].mxu1 %vm359_vm0, %v343_v15  ;;  %v346_v19 = vld [vmem:[%s1762_s18 + $0x60] sm:$0xff]  ;;  %v339_v20 = vld [vmem:[%s1762_s18 + $0x28] sm:$0xff]  ;;  %v340_v21 = vld [vmem:[%s1762_s18 + $0x30] sm:$0xff]  ;;  %p1581_p12 = pnand %p1580_p11, %p1733_p5  ;;  %p1588_p2 = por %p1587_p1, %p1586_p0 }
  0x20   : > { %1442 = vmatprep.mubr.msk.f32.mxu1 %vm359_vm0, %v344_v16  ;;  %1522 = vmatpush3.bf16.msra.mxu1 %v1519_v6  ;;  %v347_v22 = vld [vmem:[%s1762_s18 + $0x68] sm:$0xff]  ;;  %v348_v23 = vld [vmem:[%s1762_s18 + $0x70] sm:$0xff]  ;;  %v341_v24 = vld [vmem:[%s1762_s18 + $0x38] sm:$0xff] }
  0x21   : > { %1524 = vmatprep.subr.bf16.mxu1 %v1523_v13  ;;  %v349_v25 = vld [vmem:[%s1762_s18 + $0x78] sm:$0xff]  ;;  %1530 = vmatpush3.bf16.msra.mxu0 %v1527_v29  ;;  %s1974_s18 = scalar_lea.hbm %s2027_s9, %s1749_s26  ;;  %p1582_p13 = pneg %p1581_p12 }
  0x22   : > { %1431 = vmatmul.mubr.msk.f32.gmra.mrb[2].mxu0 %vm359_vm0, %v337_v14  ;;  %1532 = vmatprep.subr.bf16.mxu0 %v1531_v31 }
  0x23   : > { %1433 = vmatprep.mubr.msk.f32.mxu0 %vm359_vm0, %v338_v17  ;;  %1443 = vmatmul.mubr.msk.f32.gmra.mrb[2].mxu1 %vm359_vm0, %v345_v18  ;;  %v1327_v17 = vld [vmem:[%s2022_s4] ss:$0 sm:$0xff]  ;;  %p1589_p3 = pnand %p1588_p2, %p1582_p13 }
  0x24   : > { %1445 = vmatprep.mubr.msk.f32.mxu1 %vm359_vm0, %v346_v19  ;;  %1526 = vmatpush3.bf16.msra.mxu1 %v1523_v13 }
  0x25   : > { %1534 = vmatpush3.bf16.msra.mxu0 %v1531_v31 }
  0x26   : > { %1434 = vmatmul.mubr.msk.f32.gmra.mrb[4].mxu0 %vm359_vm0, %v339_v20 }
  0x27   : > { %1436 = vmatprep.mubr.msk.f32.mxu0 %vm359_vm0, %v340_v21  ;;  %1446 = vmatmul.mubr.msk.f32.gmra.mrb[4].mxu1 %vm359_vm0, %v347_v22 }
  0x28   : > { %1448 = vmatprep.mubr.msk.f32.mxu1 %vm359_vm0, %v348_v23 }
  0x2a   : > { %1437 = vmatmul.mubr.msk.f32.gmra.mrb[6].mxu0 %vm359_vm0, %v341_v24 }
  0x2b   : > { %1449 = vmatmul.mubr.msk.f32.gmra.mrb[6].mxu1 %vm359_vm0, %v349_v25  ;;  %vm1232_vm0 = vcmask 1048512  }
  0xf1   : > { %v1429_v33 = vpop.f32.mrb[0].mxu0 }
  0xf2   : > { %v480_v34 = vadd.f32 %v1429_v33, %v1310_v32  ;;  %v474_v35 = vpop.f32.mrb[1].mxu0  ;;  %v1441_v37 = vpop.f32.mrb[0].mxu1 }
  0xf3   : > { %v475_v36 = vadd.f32 %v1310_v32, %v474_v35  ;;  %v514_v38 = vpop.f32.mrb[1].mxu1  ;;  %v520_v0 = vadd.f32 %v1441_v37, %v1310_v32 }
  0xf4   : > { %v554_v41 = vmax.f32 %v480_v34, 0.0  ;;  %v515_v58 = vadd.f32 %v1310_v32, %v514_v38 }
  0xf5   : > { %v553_v39 = vmax.f32 %v475_v36, 0.0  ;;  %v1432_v40 = vpop.f32.mrb[2].mxu0  ;;  %v562_v5 = vmax.f32 %v520_v0, 0.0 }
  0xf6   : > { %v490_v42 = vadd.f32 %v1432_v40, %v1310_v32  ;;  %v484_v43 = vpop.f32.mrb[3].mxu0  ;;  %v1444_v45 = vpop.f32.mrb[2].mxu1  ;;  %v561_v3 = vmax.f32 %v515_v58, 0.0 }
  0xf7   : > { %v485_v44 = vadd.f32 %v1310_v32, %v484_v43  ;;  %1459 = vmatprep.mubr.msk.f32.mxu1 %vm580_vm1, %v553_v39  ;;  %v524_v46 = vpop.f32.mrb[3].mxu1  ;;  %v530_v6 = vadd.f32 %v1444_v45, %v1310_v32 }
  0xf8   : > { %1460 = vmatmul.mubr.msk.f32.vlgmr.msra.gmra.mrb[8].mxu1 %vm580_vm1, %v554_v41  ;;  %v556_v49 = vmax.f32 %v490_v42, 0.0  ;;  %v525_v4 = vadd.f32 %v1310_v32, %v524_v46 }
  0xf9   : > { %v555_v47 = vmax.f32 %v485_v44, 0.0  ;;  %v1435_v48 = vpop.f32.mrb[4].mxu0  ;;  %v564_v9 = vmax.f32 %v530_v6, 0.0 }
  0xfa   : > { %v500_v50 = vadd.f32 %v1435_v48, %v1310_v32  ;;  %v494_v51 = vpop.f32.mrb[5].mxu0  ;;  %v1447_v53 = vpop.f32.mrb[4].mxu1  ;;  %v563_v7 = vmax.f32 %v525_v4, 0.0 }
  0xfb   : > { %v495_v52 = vadd.f32 %v1310_v32, %v494_v51  ;;  %1462 = vmatprep.mubr.msk.f32.mxu1 %vm580_vm1, %v555_v47  ;;  %v534_v55 = vpop.f32.mrb[5].mxu1  ;;  %v540_v10 = vadd.f32 %v1447_v53, %v1310_v32 }
  0xfc   : > { %v558_v54 = vmax.f32 %v500_v50, 0.0  ;;  %1463 = vmatmul.mubr.msk.f32.gmra.mrb[10].mxu1 %vm580_vm1, %v556_v49  ;;  %v535_v8 = vadd.f32 %v1310_v32, %v534_v55 }
  0xfd   : > { %v557_v56 = vmax.f32 %v495_v52, 0.0  ;;  %v1438_v57 = vpop.f32.mrb[6].mxu0  ;;  %v566_v13 = vmax.f32 %v540_v10, 0.0 }
  0xfe   : > { %v510_v59 = vadd.f32 %v1438_v57, %v1310_v32  ;;  %v504_v60 = vpop.f32.mrb[7].mxu0  ;;  %v1450_v62 = vpop.f32.mrb[6].mxu1  ;;  %v565_v11 = vmax.f32 %v535_v8, 0.0  ;;  %v1862_v8 = vld [vmem:[%s2025_s7] ss:$0 sm:$0xff] }
  0xff   : > { %v505_v61 = vadd.f32 %v1310_v32, %v504_v60  ;;  %1465 = vmatprep.mubr.msk.f32.mxu1 %vm580_vm1, %v557_v56  ;;  %v544_v1 = vpop.f32.mrb[7].mxu1  ;;  %v550_v14 = vadd.f32 %v1450_v62, %v1310_v32 }
 0x100   : > { %v560_v63 = vmax.f32 %v510_v59, 0.0  ;;  %1466 = vmatmul.mubr.msk.f32.gmra.mrb[12].mxu1 %vm580_vm1, %v558_v54  ;;  %v545_v12 = vadd.f32 %v1310_v32, %v544_v1 }
 0x101   : > { %v559_v2 = vmax.f32 %v505_v61, 0.0  ;;  %v568_v16 = vmax.f32 %v550_v14, 0.0 }
 0x102   : > { %v567_v15 = vmax.f32 %v545_v12, 0.0 }
 0x103   : > { %1468 = vmatprep.mubr.msk.f32.mxu1 %vm580_vm1, %v559_v2  ;;  %v1643_v2 = vmov 0  }
 0x104   : > { %1469 = vmatmul.mubr.msk.f32.gmra.mrb[14].mxu1 %vm580_vm1, %v560_v63  ;;  %1577 = vset.pattern.permute.xlu1 %v1643_v2 }
 0x105   : > { %1471 = vmatprep.mubr.msk.f32.mxu1 %vm580_vm1, %v561_v3  ;;  %1578 = vset.pattern.permute.xlu0 %v1643_v2  ;;  %v1855_v3 = vld [vmem:[%s2024_s6] ss:$0 sm:$0xff] }
 0x108   : > { %1472 = vmatmul.mubr.msk.f32.gmra.mrb[16].mxu1 %vm580_vm1, %v562_v5 }
 0x109   : > { %1474 = vmatprep.mubr.msk.f32.mxu1 %vm580_vm1, %v563_v7 }
 0x10c   : > { %1475 = vmatmul.mubr.msk.f32.gmra.mrb[18].mxu1 %vm580_vm1, %v564_v9 }
 0x10d   : > { %1477 = vmatprep.mubr.msk.f32.mxu1 %vm580_vm1, %v565_v11 }
 0x110   : > { %1478 = vmatmul.mubr.msk.f32.gmra.mrb[20].mxu1 %vm580_vm1, %v566_v13 }
 0x111   : > { %1480 = vmatprep.mubr.msk.f32.mxu1 %vm580_vm1, %v567_v15 }
 0x114   : > { %1481 = vmatmul.mubr.msk.f32.gmra.mrb[22].mxu1 %vm580_vm1, %v568_v16 }
 0x1cb   : > { %v1461_v18 = vpop.f32.mrb[8].mxu1 }
 0x1cc   : > { %v701_v19 = vadd.f32 %v1461_v18, %v1327_v17  ;;  %v695_v20 = vpop.f32.mrb[9].mxu1 }
 0x1cd   : > { %v696_v21 = vadd.f32 %v1327_v17, %v695_v20 }
 0x1ce   : > { %v775_v24 = vmax.f32 %v701_v19, 0.0 }
 0x1cf   : > { %v774_v22 = vmax.f32 %v696_v21, 0.0  ;;  %v1464_v23 = vpop.f32.mrb[10].mxu1 }
 0x1d0   : > { %v711_v25 = vadd.f32 %v1464_v23, %v1327_v17  ;;  %v705_v26 = vpop.f32.mrb[11].mxu1 }
 0x1d1   : > { %v706_v27 = vadd.f32 %v1327_v17, %v705_v26  ;;  %1491 = vmatprep.mubr.msk.f32.mxu0 %vm580_vm1, %v774_v22 }
 0x1d2   : > { %1492 = vmatmul.mubr.msk.f32.vlgmr.msra.gmra.mrb[8].mxu0 %vm580_vm1, %v775_v24  ;;  %v777_v30 = vmax.f32 %v711_v25, 0.0 }
 0x1d3   : > { %v776_v28 = vmax.f32 %v706_v27, 0.0  ;;  %v1467_v29 = vpop.f32.mrb[12].mxu1 }
 0x1d4   : > { %v721_v31 = vadd.f32 %v1467_v29, %v1327_v17  ;;  %v715_v32 = vpop.f32.mrb[13].mxu1 }
 0x1d5   : > { %v716_v33 = vadd.f32 %v1327_v17, %v715_v32  ;;  %1494 = vmatprep.mubr.msk.f32.mxu0 %vm580_vm1, %v776_v28 }
 0x1d6   : > { %v779_v34 = vmax.f32 %v721_v31, 0.0  ;;  %1495 = vmatmul.mubr.msk.f32.gmra.mrb[10].mxu0 %vm580_vm1, %v777_v30 }
 0x1d7   : > { %v778_v35 = vmax.f32 %v716_v33, 0.0  ;;  %v1470_v36 = vpop.f32.mrb[14].mxu1 }
 0x1d8   : > { %v731_v37 = vadd.f32 %v1470_v36, %v1327_v17  ;;  %v725_v38 = vpop.f32.mrb[15].mxu1 }
 0x1d9   : > { %v726_v39 = vadd.f32 %v1327_v17, %v725_v38  ;;  %1497 = vmatprep.mubr.msk.f32.mxu0 %vm580_vm1, %v778_v35 }
 0x1da   : > { %v781_v40 = vmax.f32 %v731_v37, 0.0  ;;  %1498 = vmatmul.mubr.msk.f32.gmra.mrb[12].mxu0 %vm580_vm1, %v779_v34 }
 0x1db   : > { %v780_v41 = vmax.f32 %v726_v39, 0.0  ;;  %v1473_v42 = vpop.f32.mrb[16].mxu1 }
 0x1dc   : > { %v741_v43 = vadd.f32 %v1473_v42, %v1327_v17  ;;  %v735_v44 = vpop.f32.mrb[17].mxu1 }
 0x1dd   : > { %1500 = vmatprep.mubr.msk.f32.mxu0 %vm580_vm1, %v780_v41  ;;  %v736_v45 = vadd.f32 %v1327_v17, %v735_v44 }
 0x1de   : > { %1501 = vmatmul.mubr.msk.f32.gmra.mrb[14].mxu0 %vm580_vm1, %v781_v40  ;;  %v783_v46 = vmax.f32 %v741_v43, 0.0 }
 0x1df   : > { %v782_v47 = vmax.f32 %v736_v45, 0.0  ;;  %v1476_v48 = vpop.f32.mrb[18].mxu1 }
 0x1e0   : > { %v751_v49 = vadd.f32 %v1476_v48, %v1327_v17  ;;  %v745_v50 = vpop.f32.mrb[19].mxu1 }
 0x1e1   : > { %1503 = vmatprep.mubr.msk.f32.mxu0 %vm580_vm1, %v782_v47  ;;  %v746_v51 = vadd.f32 %v1327_v17, %v745_v50 }
 0x1e2   : > { %v785_v52 = vmax.f32 %v751_v49, 0.0  ;;  %1504 = vmatmul.mubr.msk.f32.gmra.mrb[16].mxu0 %vm580_vm1, %v783_v46 }
 0x1e3   : > { %v784_v53 = vmax.f32 %v746_v51, 0.0  ;;  %v1479_v54 = vpop.f32.mrb[20].mxu1 }
 0x1e4   : > { %v761_v55 = vadd.f32 %v1479_v54, %v1327_v17  ;;  %v755_v56 = vpop.f32.mrb[21].mxu1 }
 0x1e5   : > { %v756_v57 = vadd.f32 %v1327_v17, %v755_v56  ;;  %1506 = vmatprep.mubr.msk.f32.mxu0 %vm580_vm1, %v784_v53 }
 0x1e6   : > { %v787_v58 = vmax.f32 %v761_v55, 0.0  ;;  %1507 = vmatmul.mubr.msk.f32.gmra.mrb[18].mxu0 %vm580_vm1, %v785_v52 }
 0x1e7   : > { %v786_v59 = vmax.f32 %v756_v57, 0.0  ;;  %v1482_v60 = vpop.f32.mrb[22].mxu1 }
 0x1e8   : > { %v771_v61 = vadd.f32 %v1482_v60, %v1327_v17  ;;  %v765_v62 = vpop.f32.mrb[23].mxu1 }
 0x1e9   : > { %1509 = vmatprep.mubr.msk.f32.mxu0 %vm580_vm1, %v786_v59  ;;  %v766_v63 = vadd.f32 %v1327_v17, %v765_v62 }
 0x1ea   : > { %v789_v0 = vmax.f32 %v771_v61, 0.0  ;;  %1510 = vmatmul.mubr.msk.f32.gmra.mrb[20].mxu0 %vm580_vm1, %v787_v58 }
 0x1eb   : > { %v788_v1 = vmax.f32 %v766_v63, 0.0 }
 0x1ed   : > { %1512 = vmatprep.mubr.msk.f32.mxu0 %vm580_vm1, %v788_v1 }
 0x1ee   : > { %1513 = vmatmul.mubr.msk.f32.gmra.mrb[22].mxu0 %vm580_vm1, %v789_v0 }
 0x2a5   : > { %v1493_v4 = vpop.f32.mrb[8].mxu0 }
 0x2a6   : > { %v921_v5 = vadd.f32 %v1493_v4, %v1855_v3  ;;  %v915_v6 = vpop.f32.mrb[9].mxu0 }
 0x2a7   : > { %v916_v7 = vadd.f32 %v1855_v3, %v915_v6 }
 0x2a8   : > { %v995_v9 = vmax.f32 %v921_v5, 0.0 }
 0x2a9   : > { %v994_v10 = vmax.f32 %v916_v7, 0.0  ;;  %v1496_v11 = vpop.f32.mrb[10].mxu0 }
 0x2aa   : > { %v931_v12 = vadd.f32 %v1496_v11, %v1855_v3  ;;  %v925_v13 = vpop.f32.mrb[11].mxu0  ;;  %v1018_v14 = vmul.f32 %v1862_v8, %v995_v9  ;;  %v1081_v9 = vld [vmem:[#allocation2] sm:$0x1] }
 0x2ab   : > { %v926_v15 = vadd.f32 %v1855_v3, %v925_v13  ;;  %v1017_v18 = vmul.f32 %v1862_v8, %v994_v10 }
 0x2ac   : > { %v997_v16 = vmax.f32 %v931_v12, 0.0  ;;  %v1036_v17 = vsel %vm580_vm1, %v1018_v14, 0.0 }
 0x2ad   : > { %v996_v19 = vmax.f32 %v926_v15, 0.0  ;;  %1037 = vadd.xlane.f32.xlu0 %v1036_v17  ;;  %v1499_v20 = vpop.f32.mrb[12].mxu0  ;;  %v1033_v27 = vsel %vm580_vm1, %v1017_v18, 0.0 }
 0x2ae   : > { %v941_v21 = vadd.f32 %v1499_v20, %v1855_v3  ;;  %v935_v22 = vpop.f32.mrb[13].mxu0  ;;  %v1020_v23 = vmul.f32 %v1862_v8, %v997_v16 }
 0x2af   : > { %v936_v24 = vadd.f32 %v1855_v3, %v935_v22  ;;  %v1019_v28 = vmul.f32 %v1862_v8, %v996_v19 }
 0x2b0   : > { %v999_v25 = vmax.f32 %v941_v21, 0.0  ;;  %v1042_v26 = vsel %vm580_vm1, %v1020_v23, 0.0 }
 0x2b1   : > { %v998_v29 = vmax.f32 %v936_v24, 0.0  ;;  %1043 = vadd.xlane.f32.xlu1 %v1042_v26  ;;  %1034 = vadd.xlane.f32.xlu0 %v1033_v27  ;;  %v1502_v30 = vpop.f32.mrb[14].mxu0  ;;  %v1039_v36 = vsel %vm580_vm1, %v1019_v28, 0.0 }
 0x2b2   : > { %v951_v31 = vadd.f32 %v1502_v30, %v1855_v3  ;;  %v945_v32 = vpop.f32.mrb[15].mxu0  ;;  %v1022_v37 = vmul.f32 %v1862_v8, %v999_v25 }
 0x2b3   : > { %v946_v33 = vadd.f32 %v1855_v3, %v945_v32  ;;  %v1021_v34 = vmul.f32 %v1862_v8, %v998_v29  ;;  %v1087_v29 = vlaneseq }
 0x2b4   : > { %v1001_v35 = vmax.f32 %v951_v31, 0.0  ;;  %v1048_v46 = vsel %vm580_vm1, %v1022_v37, 0.0 }
 0x2b5   : > { %1040 = vadd.xlane.f32.xlu1 %v1039_v36  ;;  %v1000_v38 = vmax.f32 %v946_v33, 0.0  ;;  %v1045_v39 = vsel %vm580_vm1, %v1021_v34, 0.0  ;;  %v1505_v40 = vpop.f32.mrb[16].mxu0  ;;  %v1910_v32 = vshrl.u32 %v1087_v29, 7  ;;  %v1913_v33 = vand.u32 127, %v1087_v29 }
 0x2b6   : > { %1046 = vadd.xlane.f32.xlu0 %v1045_v39  ;;  %v961_v41 = vadd.f32 %v1505_v40, %v1855_v3  ;;  %v1024_v42 = vmul.f32 %v1862_v8, %v1001_v35  ;;  %v955_v43 = vpop.f32.mrb[17].mxu0 }
 0x2b7   : > { %v956_v44 = vadd.f32 %v1855_v3, %v955_v43  ;;  %v1023_v45 = vmul.f32 %v1862_v8, %v1000_v38  ;;  %v1129_v37 = vadd.s32 4294967288, %v1913_v33  ;;  %v1136_v38 = vadd.s32 4294967280, %v1913_v33 }
 0x2b8   : > { %v1003_v47 = vmax.f32 %v961_v41, 0.0  ;;  %v1054_v48 = vsel %vm580_vm1, %v1024_v42, 0.0  ;;  %v1127_v42 = vsub.s32 %v1913_v33, %v1910_v32  ;;  %v1213_v29 = vadd.s32 4294967192, %v1913_v33 }
 0x2b9   : > { %1049 = vadd.xlane.f32.xlu1 %v1048_v46  ;;  %v1508_v49 = vpop.f32.mrb[18].mxu0  ;;  %v1002_v52 = vmax.f32 %v956_v44, 0.0  ;;  %v1051_v53 = vsel %vm580_vm1, %v1023_v45, 0.0  ;;  %v1132_v43 = vsub.s32 %v1129_v37, %v1910_v32  ;;  %v1139_v45 = vsub.s32 %v1136_v38, %v1910_v32 }
 0x2ba   : > { %1055 = vadd.xlane.f32.xlu0 %v1054_v48  ;;  %v971_v50 = vadd.f32 %v1508_v49, %v1855_v3  ;;  %v965_v51 = vpop.f32.mrb[19].mxu0  ;;  %v1026_v55 = vmul.f32 %v1862_v8, %v1003_v47  ;;  %v1143_v48 = vadd.s32 4294967272, %v1913_v33 }
 0x2bb   : > { %v966_v54 = vadd.f32 %v1855_v3, %v965_v51  ;;  %v1025_v63 = vmul.f32 %v1862_v8, %v1002_v52  ;;  %v1150_v51 = vadd.s32 4294967264, %v1913_v33 }
 0x2bc   : > { %v1005_v56 = vmax.f32 %v971_v50, 0.0  ;;  %v1060_v61 = vsel %vm580_vm1, %v1026_v55, 0.0  ;;  %v1157_v55 = vadd.s32 4294967256, %v1913_v33 }
 0x2bd   : > { %v1511_v57 = vpop.f32.mrb[20].mxu0  ;;  %v1004_v60 = vmax.f32 %v966_v54, 0.0  ;;  %v1057_v4 = vsel %vm580_vm1, %v1025_v63, 0.0  ;;  %v1146_v54 = vsub.s32 %v1143_v48, %v1910_v32 }
 0x2be   : > { %1052 = vadd.xlane.f32.xlu0 %v1051_v53  ;;  %v975_v58 = vpop.f32.mrb[21].mxu0  ;;  %v1028_v59 = vmul.f32 %v1862_v8, %v1005_v56  ;;  %v981_v62 = vadd.f32 %v1511_v57, %v1855_v3 }
 0x2bf   : > { %v976_v5 = vadd.f32 %v1855_v3, %v975_v58  ;;  %v1027_v6 = vmul.f32 %v1862_v8, %v1004_v60  ;;  %v1153_v58 = vsub.s32 %v1150_v51, %v1910_v32 }
 0x2c0   : > { %v1007_v2 = vmax.f32 %v981_v62, 0.0 }
 0x2c1   : > { %v1514_v0 = vpop.f32.mrb[22].mxu0  ;;  %v1006_v7 = vmax.f32 %v976_v5, 0.0  ;;  %v1063_v10 = vsel %vm580_vm1, %v1027_v6, 0.0 }
 0x2c2   : > { %1061 = vadd.xlane.f32.xlu0 %v1060_v61  ;;  %v985_v1 = vpop.f32.mrb[23].mxu0  ;;  %v1030_v12 = vmul.f32 %v1862_v8, %v1007_v2  ;;  %v991_v13 = vadd.f32 %v1514_v0, %v1855_v3  ;;  %v1164_v61 = vadd.s32 4294967248, %v1913_v33  ;;  %v1160_v0 = vsub.s32 %v1157_v55, %v1910_v32 }
 0x2c3   : > { %v986_v11 = vadd.f32 %v1855_v3, %v985_v1  ;;  %v1029_v16 = vmul.f32 %v1862_v8, %v1006_v7  ;;  %v1066_v3 = vsel %vm580_vm1, %v1028_v59, 0.0  ;;  %v1178_v7 = vadd.s32 4294967232, %v1913_v33 }
 0x2c4   : > { %v1072_v15 = vsel %vm580_vm1, %v1030_v12, 0.0  ;;  %v1009_v17 = vmax.f32 %v991_v13, 0.0  ;;  %v1167_v2 = vsub.s32 %v1164_v61, %v1910_v32 }
 0x2c5   : > { %v1008_v14 = vmax.f32 %v986_v11, 0.0  ;;  %v1069_v18 = vsel %vm580_vm1, %v1029_v16, 0.0  ;;  %v1185_v11 = vadd.s32 4294967224, %v1913_v33  ;;  %v1181_v16 = vsub.s32 %v1178_v7, %v1910_v32 }
 0x2c6   : > { %1058 = vadd.xlane.f32.xlu0 %v1057_v4  ;;  %v1032_v21 = vmul.f32 %v1862_v8, %v1009_v17  ;;  %v1171_v4 = vadd.s32 4294967240, %v1913_v33 }
 0x2c7   : > { %v1031_v19 = vmul.f32 %v1862_v8, %v1008_v14  ;;  %v1089_v8 = vsub.s32 0, %v1910_v32 }
 0x2c8   : > { %v1078_v22 = vsel %vm580_vm1, %v1032_v21, 0.0  ;;  %v1174_v14 = vsub.s32 %v1171_v4, %v1910_v32  ;;  %v1188_v21 = vsub.s32 %v1185_v11, %v1910_v32 }
 0x2c9   : > { %v1075_v20 = vsel %vm580_vm1, %v1031_v19, 0.0 }
 0x2ca   : > { %1084 = vperm.xlu1 %1577, %v1081_v9   ;;  %1064 = vadd.xlane.f32.xlu0 %v1063_v10 }
 0x2ce   : > { %1073 = vadd.xlane.f32.xlu0 %v1072_v15 }
 0x2d2   : > { %1070 = vadd.xlane.f32.xlu0 %v1069_v18  ;;  %v1192_v18 = vadd.s32 4294967216, %v1913_v33 }
 0x2d6   : > { %1076 = vadd.xlane.f32.xlu0 %v1075_v20 }
 0x2da   : > { %1079 = vadd.xlane.f32.xlu0 %v1078_v22 }
 0x2ee   : > { %1067 = vadd.xlane.f32.xlu1 %v1066_v3  ;;  %v1199_v3 = vadd.s32 4294967208, %v1913_v33 }
 0x33a   : > { %v1038_v23 = vpop.xlane.xlu0 %1037 }
 0x33e   : > { %v1035_v24 = vpop.xlane.xlu0 %1034  ;;  %v1044_v25 = vpop.xlane.xlu1 %1043 }
 0x342   : > { %v1041_v27 = vpop.xlane.xlu1 %1040 }
 0x343   : > { %v1047_v26 = vpop.xlane.xlu0 %1046 }
 0x346   : > { %v1050_v30 = vpop.xlane.xlu1 %1049 }
 0x347   : > { %v1056_v28 = vpop.xlane.xlu0 %1055 }
 0x34a   : > { %v1085_v34 = vpop.permute.xlu1 %1084 }
 0x34b   : > { %v1053_v31 = vpop.xlane.xlu0 %1052  ;;  %v1915_v36 = vrot.slane %v1085_v34, %v1089_v8  ;;  %v1202_v8 = vsub.s32 %v1199_v3, %v1910_v32 }
 0x34d   : > { %v1091_v40 = vadd.f32 %v1915_v36, %v1035_v24  ;;  %v1092_v41 = vadd.f32 %v1915_v36, %v1038_v23  ;;  %v1093_v44 = vadd.f32 %v1915_v36, %v1041_v27  ;;  %v1094_v52 = vadd.f32 %v1915_v36, %v1044_v25 }
 0x34e   : > { %v1095_v56 = vadd.f32 %v1915_v36, %v1047_v26  ;;  %v1096_v62 = vadd.f32 %v1915_v36, %v1050_v30  ;;  %v1097_v6 = vadd.f32 %v1915_v36, %v1053_v31  ;;  %v1098_v13 = vadd.f32 %v1915_v36, %v1056_v28 }
 0x34f   : > { %v1062_v35 = vpop.xlane.xlu0 %1061  ;;  %v1128_v46 = vrot.slane %v1091_v40, %v1127_v42  ;;  %v1133_v47 = vrot.slane %v1092_v41, %v1132_v43  ;;  %v1140_v50 = vrot.slane %v1093_v44, %v1139_v45  ;;  %v1147_v60 = vrot.slane %v1094_v52, %v1146_v54 }
 0x350   : > { %v1154_v1 = vrot.slane %v1095_v56, %v1153_v58  ;;  %v1161_v10 = vrot.slane %v1096_v62, %v1160_v0  ;;  %v1168_v15 = vrot.slane %v1097_v6, %v1167_v2  ;;  %v1175_v22 = vrot.slane %v1098_v13, %v1174_v14 }
 0x351   : > { %v1135_v53 = vsel %vm1134_vm2, %v1133_v47, %v1128_v46  ;;  %v1195_v24 = vsub.s32 %v1192_v18, %v1910_v32  ;;  %v1206_v26 = vadd.s32 4294967200, %v1913_v33  ;;  %v1100_v27 = vadd.f32 %v1915_v36, %v1062_v35 }
 0x352   : > { %v1142_v57 = vsel %vm1141_vm3, %v1140_v50, %v1135_v53  ;;  %v1220_v30 = vadd.s32 4294967184, %v1913_v33  ;;  %v1227_v31 = vadd.s32 4294967176, %v1913_v33  ;;  %v1216_v42 = vsub.s32 %v1213_v29, %v1910_v32 }
 0x353   : > { %v1059_v39 = vpop.xlane.xlu0 %1058  ;;  %v1149_v63 = vsel %vm1148_vm4, %v1147_v60, %v1142_v57  ;;  %v1209_v38 = vsub.s32 %v1206_v26, %v1910_v32  ;;  %v1189_v41 = vrot.slane %v1100_v27, %v1188_v21 }
 0x354   : > { %v1156_v5 = vsel %vm1155_vm5, %v1154_v1, %v1149_v63  ;;  %v1099_v17 = vadd.f32 %v1915_v36, %v1059_v39  ;;  %v1223_v44 = vsub.s32 %v1220_v30, %v1910_v32  ;;  %v1230_v46 = vsub.s32 %v1227_v31, %v1910_v32 }
 0x355   : > { %v1163_v12 = vsel %vm1162_vm6, %v1161_v10, %v1156_v5 }
 0x356   : > { %v1170_v19 = vsel %vm1169_vm7, %v1168_v15, %v1163_v12  ;;  %v1182_v23 = vrot.slane %v1099_v17, %v1181_v16 }
 0x357   : > { %v1065_v49 = vpop.xlane.xlu0 %1064  ;;  %v1177_v28 = vsel %vm1176_vm8, %v1175_v22, %v1170_v19 }
 0x358   : > { %v1101_v25 = vadd.f32 %v1915_v36, %v1065_v49  ;;  %v1184_v34 = vsel %vm1183_vm9, %v1182_v23, %v1177_v28 }
 0x359   : > { %v1191_v47 = vsel %vm1190_vm10, %v1189_v41, %v1184_v34 }
 0x35a   : > { %v1196_v37 = vrot.slane %v1101_v25, %v1195_v24 }
 0x35b   : > { %v1074_v59 = vpop.xlane.xlu0 %1073 }
 0x35c   : > { %v1104_v43 = vadd.f32 %v1915_v36, %v1074_v59  ;;  %v1198_v50 = vsel %vm1197_vm11, %v1196_v37, %v1191_v47 }
 0x35e   : > { %v1217_v52 = vrot.slane %v1104_v43, %v1216_v42 }
 0x35f   : > { %v1071_v9 = vpop.xlane.xlu0 %1070 }
 0x360   : > { %v1103_v39 = vadd.f32 %v1915_v36, %v1071_v9 }
 0x362   : > { %v1210_v51 = vrot.slane %v1103_v39, %v1209_v38 }
 0x363   : > { %v1077_v20 = vpop.xlane.xlu0 %1076 }
 0x364   : > { %v1105_v45 = vadd.f32 %v1915_v36, %v1077_v20 }
 0x366   : > { %v1224_v32 = vrot.slane %v1105_v45, %v1223_v44 }
 0x367   : > { %v1080_v35 = vpop.xlane.xlu0 %1079 }
 0x368   : > { %v1106_v48 = vadd.f32 %v1915_v36, %v1080_v35 }
 0x36a   : > { %v1231_v55 = vrot.slane %v1106_v48, %v1230_v46 }
 0x37b   : > { %v1068_v40 = vpop.xlane.xlu1 %1067 }
 0x37c   : > { %v1102_v33 = vadd.f32 %v1915_v36, %v1068_v40 }
 0x37e   : > { %v1203_v49 = vrot.slane %v1102_v33, %v1202_v8 }
 0x380   : > { %v1205_v53 = vsel %vm1204_vm12, %v1203_v49, %v1198_v50 }
 0x381   : > { %v1212_v54 = vsel %vm1211_vm13, %v1210_v51, %v1205_v53 }
 0x382   : > { %v1219_v36 = vsel %vm1218_vm14, %v1217_v52, %v1212_v54 }
 0x383   : > { %v1226_v56 = vsel %vm1225_vm15, %v1224_v32, %v1219_v36 }
 0x384   : > { %v1233_v57 = vsel %vm1232_vm0, %v1231_v55, %v1226_v56 }
 0x385   : > { %1235 = vst [vmem:[%s327_s10] sm:$0x1] %v1233_v57 }
 0x386   : > { %1592 = shalt.err (!%p1589_p3)
}
 0x387   : > { %s1593_s26 = scalar_lea.hbm %s1974_s18, 16  ;;  %s1597_s30 = scalar_lea.hbm %s2027_s9, 32 }
 0x388   : > { %p1594_p4 = scmp.ne.s32.totalorder %s1974_s18, %s1593_s26  ;;  %p1598_p9 = scmp.lt.u32.totalorder %s1974_s18, %s2027_s9 }
 0x389   : > { %p1599_p10 = scmp.lt.u32.totalorder %s1597_s30, %s1593_s26  ;;  %p1601_p12 = scmp.lt.u32.totalorder %s1593_s26, %s1974_s18 }
 0x38a   : > { %p1595_p7 = pnand %p1594_p4, %p1733_p5 }
 0x38b   : > { %p1600_p11 = por %p1599_p10, %p1598_p9 }
 0x38c   : > { %p1596_p8 = pneg %p1595_p7 }
 0x38d   : > { %p1602_p13 = por %p1601_p12, %p1600_p11 }
 0x38f   : > { %p1603_p0 = pnand %p1602_p13, %p1596_p8 }
 0x391   : > { %1606 = shalt.err (!%p1603_p0)
}
 0x392   : > { %1537 = dma.vmem_to_hbm [thread:$0]  (%p1733_p5), %s1976_s8, 16, %s1974_s18, %s1237_s22  }
 0x393 PF: > { %p1543_p1 = scmp.ge.s32.totalorder %s1641_s14, 2  ;;  %s1261_s17 = sand.u32 1, %s1629_s11  }
 0x394   : > { %s1262_s23 = scalar_lea.sflag [#allocation4], %s1261_s17 }
 0x395   : > { %p1540_p2 = pnand %p1543_p1, %p1737_p6 }
 0x397   : > { %1624 = dma.done.wait (!%p1540_p2), %s1262_s23, 16  }
 0x398   : > { %1626 = vsyncadd (!%p1540_p2), %s1262_s23, 4294967280  ;;  %p21_p3 = scmp.ge.s32.totalorder %s1721_s16, 4   ;;  %s2030_s11 = smov %s1633_s12 }
 0x399   : > { %s2031_s12 = smov %s1637_s13  ;;  %s2032_s13 = smov %s1731_s19 }
 0x39a   : > { %s2033_s14 = smov %s1721_s16  ;;  %23 = sbr.rel (!%p21_p3) target bundleno = 6 (0x6), region = 91 }
 0x3a1   :  { %1266 = vsyncpa [#allocation4], 1 }
 0x3a2   :  { %1268 = vsyncpa [#allocation4 + $0x1], 1 }

</bundles_post_ra>
